<compile_context>
chip_gen: v7x
topology: tpu7x:2x2x1
jax: 0.10.0
libtpu: 0.0.40
codegen_flags: <defaults>
</compile_context>

<pallas_src>
import functools

import numpy as np
import jax
import jax.numpy as jnp
from jax.experimental import pallas as pl
from jax.experimental.pallas import tpu as pltpu


# ----------------------------------------------------------------------------
# Helpers
# ----------------------------------------------------------------------------
def _round_up(x, m):
    return ((x + m - 1) // m) * m


def _cdiv(a, b):
    return -(-a // b)


def _sublane(itemsize):
    return {4: 8, 2: 16, 1: 32}.get(int(itemsize), 8)


def _nearest_src_index(out_size, in_size):
    """PyTorch F.interpolate(mode='nearest') source index (float32 scale)."""
    scale = np.float32(in_size) / np.float32(out_size)
    o = np.arange(out_size, dtype=np.float32)
    src = np.floor(o * scale).astype(np.int64)
    return np.minimum(src, in_size - 1).astype(np.int32)


def _nearest_select_matrix(out_size, in_size, dtype):
    """0/1 matrix S (out_size, in_size): S[o, i] = 1 iff i == src(o)."""
    s = np.zeros((out_size, in_size), dtype=np.float32)
    s[np.arange(out_size), _nearest_src_index(out_size, in_size)] = 1.0
    return jnp.asarray(s, dtype=dtype)


def _nearest_kron_matrix_T(h_out, w_out, h_in, w_in, dtype):
    """kron(S_h, S_w)^T, shape (H_in*W_in, H_out*W_out), 0/1 entries."""
    s_h = np.zeros((h_out, h_in), np.float32)
    s_h[np.arange(h_out), _nearest_src_index(h_out, h_in)] = 1.0
    s_w = np.zeros((w_out, w_in), np.float32)
    s_w[np.arange(w_out), _nearest_src_index(w_out, w_in)] = 1.0
    return jnp.asarray(np.kron(s_h, s_w).T, dtype=dtype)


def _vmem_limits():
    """Chip-aware (scoped_vmem_limit, tile-chooser budget) in bytes."""
    cap = 64 * 1024 * 1024  # conservative default (v7x per-TensorCore VMEM)
    try:
        info = pltpu.get_tpu_info()
        cap = int(getattr(info, "vmem_capacity_bytes", cap)) or cap
    except Exception:
        pass
    limit = min((cap * 3) // 4, 112 * 1024 * 1024)  # leave compiler headroom
    budget = limit // 2                             # chooser target
    return limit, budget


# ----------------------------------------------------------------------------
# Kernels
# ----------------------------------------------------------------------------
def _kron_kernel(s_ref, x_ref, o_ref):
    # s_ref: (K_in, K_out) resident 0/1 selection (Kronecker), x_ref: (B, K_in)
    o_ref[...] = jnp.dot(
        x_ref[...], s_ref[...], preferred_element_type=jnp.float32
    ).astype(o_ref.dtype)


def _factored_kernel(s_h_ref, s_wt_ref, x_ref, o_ref, *, w_first):
    # s_h_ref : (TH, H_in)      row-selection tile
    # s_wt_ref: (W_in, W_out)   transposed col-selection
    # x_ref   : (B, H_in, W_in) flattened (n, c) slabs
    # o_ref   : (B, TH, W_out)
    cdt = x_ref.dtype
    b, h_in, w_in = x_ref.shape
    th = s_h_ref.shape[0]
    w_out = s_wt_ref.shape[1]
    x = x_ref[...]
    # Broadcast selection operands once per step -> standard batched matmuls
    # (guaranteed Mosaic lowering, bounded live ranges, no per-b Python loop).
    s_h_b = jnp.broadcast_to(s_h_ref[...][None], (b, th, h_in))
    s_wt_b = jnp.broadcast_to(s_wt_ref[...][None], (b, w_in, w_out))
    if w_first:
        tmp = jnp.einsum("bhw,bwo->bho", x, s_wt_b,
                         preferred_element_type=jnp.float32).astype(cdt)
        out = jnp.einsum("bth,bho->bto", s_h_b, tmp,
                         preferred_element_type=jnp.float32)
    else:
        tmp = jnp.einsum("bth,bhw->btw", s_h_b, x,
                         preferred_element_type=jnp.float32).astype(cdt)
        out = jnp.einsum("btw,bwo->bto", tmp, s_wt_b,
                         preferred_element_type=jnp.float32)
    o_ref[...] = out.astype(o_ref.dtype)


# ----------------------------------------------------------------------------
# Tile choosers (padded-footprint aware)
# ----------------------------------------------------------------------------
def _choose_b_kron(nc, k_in, k_out, itemsize, budget):
    sub = _sublane(itemsize)
    k_in_l = _round_up(k_in, 128)
    k_out_l = _round_up(k_out, 128)
    s_bytes = 2 * _round_up(k_in, sub) * k_out_l * itemsize  # dbl-buffered S

    def fits(b):
        x_blk = 2 * b * k_in_l * itemsize      # double-buffered input block
        o_blk = 2 * b * k_out_l * itemsize     # double-buffered output block
        acc = b * k_out_l * 4                  # f32 matmul result before cast
        return s_bytes + x_blk + o_blk + acc <= budget

    b = min(_round_up(nc, sub), 4096)
    while b > sub and not fits(b):
        b -= sub
    # Keep >= 2 grid steps when worthwhile (v7x has two TensorCores).
    if nc > sub and _cdiv(nc, b) < 2 and b >= 2 * sub:
        b = max(sub, _round_up(_cdiv(nc, 2), sub))
    return b


def _choose_tiles_factored(nc, h_in, w_in, h_out, w_out, itemsize, budget):
    sub = _sublane(itemsize)
    h_in_s = _round_up(h_in, sub)
    w_in_s = _round_up(w_in, sub)
    h_in_l = _round_up(h_in, 128)
    w_in_l = _round_up(w_in, 128)
    w_out_l = _round_up(w_out, 128)

    def fits(b, th):
        th_s = _round_up(th, sub)
        x_blk = 2 * b * h_in_s * w_in_l * itemsize
        o_blk = 2 * b * th_s * w_out_l * itemsize
        sel = 2 * (th_s * h_in_l + w_in_s * w_out_l) * itemsize
        bcast = b * (th_s * h_in_l + w_in_s * w_out_l) * itemsize
        interm = b * max(h_in_s * w_out_l, th_s * w_in_l) * (4 + itemsize)
        acc = b * th_s * w_out_l * 4
        return x_blk + o_blk + sel + bcast + interm + acc <= budget

    th_candidates = [h_out] + sorted(
        {d for d in range(sub, h_out, sub) if h_out % d == 0}, reverse=True)
    b_hi = min(_round_up(nc, sub), 256)
    for th in th_candidates:
        b = b_hi
        while b >= sub:
            if fits(b, th):
                if (nc > sub and _cdiv(nc, b) * (h_out // th) < 2
                        and b >= 2 * sub):
                    b = max(sub, _round_up(_cdiv(nc, 2), sub))
                return b, th
            b -= sub
    # Nothing fit the (conservative) budget: smallest tile, still has headroom
    # because the scoped VMEM limit is 2x the chooser budget.
    return sub, th_candidates[-1]


# ----------------------------------------------------------------------------
# pallas_call wrappers
# ----------------------------------------------------------------------------
def _kron_path(x, orig_hw, budget, vmem_limit):
    N, C, H_in, W_in = x.shape
    H_out, W_out = orig_hw
    NC = N * C
    dt = x.dtype
    itemsize = dt.itemsize
    k_in, k_out = H_in * W_in, H_out * W_out

    B = _choose_b_kron(NC, k_in, k_out, itemsize, budget)
    nc_pad = _round_up(NC, B)
    x2d = x.reshape(NC, k_in)
    if nc_pad != NC:
        x2d = jnp.pad(x2d, ((0, nc_pad - NC), (0, 0)))

    s_kron = _nearest_kron_matrix_T(H_out, W_out, H_in, W_in, dt)

    cost = pl.CostEstimate(
        flops=2 * nc_pad * k_in * k_out,
        transcendentals=0,
        bytes_accessed=(nc_pad * (k_in + k_out) + k_in * k_out) * itemsize)

    out2d = pl.pallas_call(
        _kron_kernel,
        out_shape=jax.ShapeDtypeStruct((nc_pad, k_out), dt),
        grid_spec=pltpu.PrefetchScalarGridSpec(
            num_scalar_prefetch=0,
            grid=(nc_pad // B,),
            in_specs=[
                pl.BlockSpec((k_in, k_out), lambda i: (0, 0)),  # resident S
                pl.BlockSpec((B, k_in), lambda i: (i, 0)),
            ],
            out_specs=pl.BlockSpec((B, k_out), lambda i: (i, 0)),
        ),
        compiler_params=pltpu.CompilerParams(
            dimension_semantics=("parallel",),
            vmem_limit_bytes=vmem_limit),
        cost_estimate=cost,
    )(s_kron, x2d)
    return out2d[:NC].reshape(N, C, H_out, W_out)


def _factored_path(x, orig_hw, budget, vmem_limit):
    N, C, H_in, W_in = x.shape
    H_out, W_out = orig_hw
    NC = N * C
    dt = x.dtype
    itemsize = dt.itemsize

    B, TH = _choose_tiles_factored(NC, H_in, W_in, H_out, W_out, itemsize,
                                   budget)
    num_h = H_out // TH
    nc_pad = _round_up(NC, B)
    x3d = x.reshape(NC, H_in, W_in)
    if nc_pad != NC:
        x3d = jnp.pad(x3d, ((0, nc_pad - NC), (0, 0), (0, 0)))

    # With H_out tiled, do the H-expansion first (no redundant W work per
    # h-tile); otherwise order by the smaller live intermediate.
    w_first = (num_h == 1) and (H_in * W_out <= H_out * W_in)

    s_h = _nearest_select_matrix(H_out, H_in, dt)      # (H_out, H_in)
    s_wt = _nearest_select_matrix(W_out, W_in, dt).T   # (W_in, W_out)

    cost = pl.CostEstimate(
        flops=2 * nc_pad * (H_in * W_in * W_out + H_in * H_out * W_out),
        transcendentals=0,
        bytes_accessed=nc_pad * (H_in * W_in + H_out * W_out) * itemsize)

    out3d = pl.pallas_call(
        functools.partial(_factored_kernel, w_first=w_first),
        out_shape=jax.ShapeDtypeStruct((nc_pad, H_out, W_out), dt),
        grid_spec=pltpu.PrefetchScalarGridSpec(
            num_scalar_prefetch=0,
            grid=(nc_pad // B, num_h),
            in_specs=[
                pl.BlockSpec((TH, H_in), lambda i, j: (j, 0)),
                pl.BlockSpec((W_in, W_out), lambda i, j: (0, 0)),
                pl.BlockSpec((B, H_in, W_in), lambda i, j: (i, 0, 0)),
            ],
            out_specs=pl.BlockSpec((B, TH, W_out), lambda i, j: (i, j, 0)),
        ),
        compiler_params=pltpu.CompilerParams(
            dimension_semantics=("parallel", "parallel"),
            vmem_limit_bytes=vmem_limit),
        cost_estimate=cost,
    )(s_h, s_wt, x3d)
    return out3d[:NC].reshape(N, C, H_out, W_out)


@functools.partial(jax.jit, static_argnames=("orig_hw", "force_factored"))
def _interpolate_nearest_pallas(x, orig_hw, force_factored=False):
    _, _, H_in, W_in = x.shape
    H_out, W_out = orig_hw
    dt = x.dtype
    itemsize = dt.itemsize
    vmem_limit, budget = _vmem_limits()
    sub = _sublane(itemsize)
    k_in, k_out = H_in * W_in, H_out * W_out

    s_kron_bytes = 2 * _round_up(k_in, sub) * _round_up(k_out, 128) * itemsize
    use_kron = ((not force_factored)
                and k_in * itemsize <= 1024                # stay memory-bound
                and s_kron_bytes <= min(budget // 2, 8 * 1024 * 1024))
    if use_kron:
        return _kron_path(x, orig_hw, budget, vmem_limit)
    return _factored_path(x, orig_hw, budget, vmem_limit)


# ----------------------------------------------------------------------------
# Reference + module
# ----------------------------------------------------------------------------
def _reference_nearest(x, orig_hw):
    """Pure-JAX gather reference matching PyTorch mode='nearest'."""
    H_out, W_out = orig_hw
    H_in, W_in = x.shape[-2], x.shape[-1]
    hsrc = _nearest_src_index(H_out, H_in)
    wsrc = _nearest_src_index(W_out, W_in)
    return x[..., hsrc, :][..., wsrc]


class InterpolateToOrig:
    """JAX/Pallas equivalent of the PyTorch module.

    PyTorch attaches the original tensor as `x.orig`; here the original
    spatial size is passed explicitly as `orig_hw`.
    """

    def __init__(self, mode="nearest"):
        assert mode == "nearest", "only 'nearest' mode implemented"
        # TODO(synk): other F.interpolate modes (bilinear, ...) not implemented.
        self.mode = mode

    def __call__(self, x, orig_hw, *, force_factored=False):
        orig_hw = tuple(int(s) for s in orig_hw)
        if orig_hw == tuple(x.shape[-2:]):
            return x
        if not jnp.issubdtype(x.dtype, jnp.floating):
            # TODO(synk): integer dtypes use an exact pure-JAX gather path.
            return _reference_nearest(x, orig_hw)
        return _interpolate_nearest_pallas(x, orig_hw=orig_hw,
                                           force_factored=force_factored)


# ----------------------------------------------------------------------------
# Self-test
# ----------------------------------------------------------------------------
if __name__ == "__main__":
    key = jax.random.PRNGKey(0)
    mod = InterpolateToOrig(mode="nearest")

    # 1) Small map, f32 -> Kronecker single-matmul path (lane-dense output).
    N, C, H_in, W_in = 2, 4, 8, 8
    H_out, W_out = 16, 16
    x = jax.random.normal(key, (N, C, H_in, W_in), dtype=jnp.float32)
    out = jax.block_until_ready(mod(x, (H_out, W_out)))
    ref = _reference_nearest(x, (H_out, W_out))
    assert out.shape == (N, C, H_out, W_out)
    assert jnp.allclose(out, ref, atol=1e-6, rtol=1e-6)

    # 2) Larger NC -> multi-step grid (>= 2 programs) on the Kron path.
    xg = jax.random.normal(jax.random.PRNGKey(1), (2, 16, 8, 8),
                           dtype=jnp.float32)
    outg = jax.block_until_ready(mod(xg, (H_out, W_out)))
    assert jnp.allclose(outg, _reference_nearest(xg, (H_out, W_out)),
                        atol=1e-6, rtol=1e-6)

    # 3) bf16 stays bf16 on the MXU; 0/1 selection is bit-exact.
    xb = x.astype(jnp.bfloat16)
    out_b = jax.block_until_ready(mod(xb, (H_out, W_out)))
    assert out_b.dtype == jnp.bfloat16
    assert jnp.array_equal(out_b, _reference_nearest(xb, (H_out, W_out)))

    # 4) Non-integer scale + NC padding (NC=3 padded to a full block).
    x2 = jax.random.normal(jax.random.PRNGKey(2), (1, 3, 8, 8),
                           dtype=jnp.float32)
    out2 = jax.block_until_ready(mod(x2, (12, 20)))
    assert jnp.allclose(out2, _reference_nearest(x2, (12, 20)),
                        atol=1e-6, rtol=1e-6)

    # 5) Factored path, w-first branch (forced; used for large maps).
    out_f = jax.block_until_ready(mod(x, (H_out, W_out), force_factored=True))
    assert jnp.allclose(out_f, ref, atol=1e-6, rtol=1e-6)

    # 6) Factored path, h-first branch (forced).
    out_f2 = jax.block_until_ready(mod(x2, (12, 20), force_factored=True))
    assert jnp.allclose(out_f2, _reference_nearest(x2, (12, 20)),
                        atol=1e-6, rtol=1e-6)

    # 7) Same-shape case: passthrough.
    assert mod(x, (H_in, W_in)) is x

    print("KERNEL_OK")
</pallas_src>

<mosaic_0001>
module attributes {stable_mosaic.version = 11 : i64} {
  func.func @_kron_kernel(%arg0: i32, %arg1: memref<64x256xf32, #tpu.memory_space<vmem>>, %arg2: memref<8x64xf32, #tpu.memory_space<vmem>>, %arg3: memref<8x256xf32, #tpu.memory_space<vmem>>) attributes {dimension_semantics = [#tpu.dimension_semantics<parallel>], iteration_bounds = array<i64: 1>, scalar_prefetch = 0 : i64, scratch_operands = 0 : i64, tpu.core_type = #tpu.core_type<tc>, window_params = [{pipeline_mode = #tpu.pipeline_mode<synchronous>, transform_indices = @transform_0, window_bounds = array<i64: 64, 256>}, {transform_indices = @transform_1, window_bounds = array<i64: 8, 64>}, {transform_indices = @transform_2, window_bounds = array<i64: 8, 256>}]} {
    %c0 = arith.constant 0 : index
    %c0_0 = arith.constant 0 : index
    %0 = vector.load %arg2[%c0, %c0_0] : memref<8x64xf32, #tpu.memory_space<vmem>>, vector<8x64xf32>
    %c0_1 = arith.constant 0 : index
    %c0_2 = arith.constant 0 : index
    %1 = vector.load %arg1[%c0_1, %c0_2] : memref<64x256xf32, #tpu.memory_space<vmem>>, vector<64x256xf32>
    %cst = arith.constant dense<0.000000e+00> : vector<8x256xf32>
    %2 = tpu.matmul %0, %1, %cst {dimension_numbers = #tpu.dot_dimension_numbers<[1], [0], [0], [1], [0, 0, 1, 1], [], []>} : vector<8x64xf32>, vector<64x256xf32>, vector<8x256xf32> -> vector<8x256xf32>
    %c0_3 = arith.constant 0 : index
    %c0_4 = arith.constant 0 : index
    %3 = vector.load %arg3[%c0_3, %c0_4] : memref<8x256xf32, #tpu.memory_space<vmem>>, vector<8x256xf32>
    tpu.vector_store %arg3[%c0_3, %c0_4], %2 {strides = array<i32>} : memref<8x256xf32, #tpu.memory_space<vmem>>, vector<8x256xf32>,
    return
  }
  func.func @transform_0(%arg0: i32) -> (i32, i32) {
    %c0_i32 = arith.constant 0 : i32
    %c0_i32_0 = arith.constant 0 : i32
    %c0_i32_1 = arith.constant 0 : i32
    return %c0_i32, %c0_i32_0 : i32, i32
  }
  func.func @transform_1(%arg0: i32) -> (i32, i32) {
    %c0_i32 = arith.constant 0 : i32
    %c0_i32_0 = arith.constant 0 : i32
    return %arg0, %c0_i32 : i32, i32
  }
  func.func @transform_2(%arg0: i32) -> (i32, i32) {
    %c0_i32 = arith.constant 0 : i32
    %c0_i32_0 = arith.constant 0 : i32
    return %arg0, %c0_i32 : i32, i32
  }
}

</mosaic_0001>

<bundles_post_ra>
// kernel: _interpolate_nearest_pallas.1
= control target key start
LH: loop header
LB: loop body
LE: loop exit
PB: predicated region body
PF: predicated region fallthrough
CT: control target
= control target key end

     0   :  { %7 = vsyncpa [#allocation3], 0  ;;  %s169_s9 = smov [#allocation2]   ;;  %s209_s0 = inlined_call_operand.hbm [shape: f32[64,256], index: 0, kind: input, shape index: {}]   ;;  %s210_s1 = inlined_call_operand.vmem [shape: f32[8,64], index: 1, kind: input, shape index: {}]   ;;  %s211_s2 = inlined_call_operand.vmem [shape: f32[8,256], index: 2, kind: output, shape index: {}]  }
   0x1   :  { %s13_s10 = sshll.u32 %s169_s9, 4  ;;  %s145_s13 = scalar_lea.hbm %s209_s0, 2048  ;;  %s14_s10 = int_to_ptr.vmem [resolvable:$true] %s13_s10 }
   0x2   :  { %p146_p0 = scmp.ne.s32.totalorder %s209_s0, %s145_s13  ;;  %p149_p1 = scmp.lt.u32.totalorder %s145_s13, %s209_s0 }
   0x4   :  { %p151_p2 = pnand %p149_p1, %p146_p0 }
   0x6   :  { %154 = shalt.err (!%p151_p2)
}
   0x7   :  { %s155_s18 = scalar_lea.vmem %s14_s10, 2048  ;;  %p160_p4 = scmp.lt.s32.totalorder %s14_s10, %s14_s10 }
   0x8   :  { %p156_p3 = scmp.ne.s32.totalorder %s14_s10, %s155_s18  ;;  %p161_p5 = scmp.lt.s32.totalorder %s155_s18, %s155_s18 }
   0xa   :  { %p162_p6 = por %p161_p5, %p160_p4 }
   0xc   :  { %p163_p7 = pnand %p162_p6, %p156_p3 }
   0xe   :  { %166 = shalt.err (!%p163_p7)
}
   0xf   :  { %s170_s19 = smov 256   ;;  %s171_s20 = smov 16  }
  0x10   :  { %19 = dma.hbm_to_vmem [thread:$0]  %s209_s0, 2048, %s14_s10, [#allocation3], %s170_s19, %s170_s19, %s171_s20  }
  0x11   :  { %167 = dma.done.wait [#allocation3], 2048  }
  0x12   :  { %168 = vsyncadd [#allocation3], 4294965248  ;;  %v172_v0 = vmov 0.0   ;;  %v27_v1 = vld [vmem:[#allocation2 + $0x8] sm:$0xff]  ;;  %v29_v2 = vld [vmem:[#allocation2 + $0x18] sm:$0xff]  ;;  %vm42_vm0 = vcmask 523264  }
  0x13   :  { %110 = vmatprep.mubr.f32.mxu0 %v172_v0  ;;  %v26_v3 = vld [vmem:[#allocation2] sm:$0xff]  ;;  %v125_v4 = vpack.c.bf16 %v29_v2, %v27_v1  ;;  %v28_v5 = vld [vmem:[#allocation2 + $0x10] sm:$0xff]  ;;  %v31_v6 = vld [vmem:[#allocation2 + $0x28] sm:$0xff] }
  0x14   :  { %v33_v7 = vld [vmem:[#allocation2 + $0x38] sm:$0xff]  ;;  %v127_v8 = vpack.c.bf16 %v28_v5, %v26_v3  ;;  %v30_v10 = vld [vmem:[#allocation2 + $0x20] sm:$0xff]  ;;  %v32_v11 = vld [vmem:[#allocation2 + $0x30] sm:$0xff] }
  0x15   :  { %v129_v9 = vpack.c.bf16 %v33_v7, %v31_v6  ;;  %v35_v12 = vld [vmem:[#allocation2 + $0x48] sm:$0xff]  ;;  %126 = vmatprep.subr.bf16.mxu0 %v125_v4  ;;  %v37_v13 = vld [vmem:[#allocation2 + $0x58] sm:$0xff]  ;;  %v131_v14 = vpack.c.bf16 %v32_v11, %v30_v10  ;;  %v34_v16 = vld [vmem:[#allocation2 + $0x40] sm:$0xff] }
  0x16   :  { %128 = vmatpush1.bf16.msra.mxu0 %v127_v8  ;;  %v133_v15 = vpack.c.bf16 %v37_v13, %v35_v12  ;;  %v36_v17 = vld [vmem:[#allocation2 + $0x50] sm:$0xff]  ;;  %v39_v18 = vld [vmem:[#allocation2 + $0x68] sm:$0xff]  ;;  %v41_v19 = vld [vmem:[#allocation2 + $0x78] sm:$0xff] }
  0x17   :  { %130 = vmatprep.subr.bf16.mxu0 %v129_v9  ;;  %v135_v20 = vpack.c.bf16 %v36_v17, %v34_v16  ;;  %v137_v21 = vpack.c.bf16 %v41_v19, %v39_v18  ;;  %v38_v22 = vld [vmem:[#allocation2 + $0x60] sm:$0xff]  ;;  %v40_v23 = vld [vmem:[#allocation2 + $0x70] sm:$0xff] }
  0x18   :  { %v139_v24 = vpack.c.bf16 %v40_v23, %v38_v22  ;;  %v25_v25 = vld [vmem:[%s210_s1] sm:$0xff] }
  0x1a   :  { %132 = vmatpush1.bf16.msra.mxu0 %v131_v14 }
  0x1b   :  { %134 = vmatprep.subr.bf16.mxu0 %v133_v15 }
  0x1e   :  { %136 = vmatpush1.bf16.msra.mxu0 %v135_v20 }
  0x1f   :  { %138 = vmatprep.subr.bf16.mxu0 %v137_v21 }
  0x22   :  { %140 = vmatpush1.bf16.msra.mxu0 %v139_v24 }
  0x25   :  { %124 = vmatmul.mubr.msk.f32.vlgmr.msra.gmra.mrb[0].mxu0 %vm42_vm0, %v25_v25 }
  0xf8   :  { %v112_v26 = vpop.f32.mrb[0].mxu0 }
  0xf9   :  { %117 = vst [vmem:[%s211_s2] sm:$0xff] %v112_v26  ;;  %v114_v27 = vpop.f32.mrb[1].mxu0 }
  0xfa   :  { %118 = vst [vmem:[%s211_s2 + $0x8] sm:$0xff] %v114_v27 }
  0xfb   :  { %123 = vsyncpa [#allocation3], 1 }

</bundles_post_ra>
